<compile_context>
chip_gen: v7x
topology: tpu7x:2x2x1
jax: 0.10.0
libtpu: 0.0.40
codegen_flags: <defaults>
</compile_context>

<pallas_src>
import functools

import jax
import jax.numpy as jnp
from jax.experimental import pallas as pl
from jax.experimental.pallas import tpu as pltpu

LANE = 128   # vreg / MXU lane width
SUB = 16     # bf16 sublane packing multiple


def _round_up(n, m):
    return ((n + m - 1) // m) * m


# ----------------------------------------------------------------------------
# Kernel
# ----------------------------------------------------------------------------
def _contrastive_kernel(
    x_ref,      # (TB, TK)        f32   flattened input tile (cast to bf16 here)
    wb_ref,     # (Dp,Hp)|(TK,Hp) bf16  backbone weight (resident or K-streamed)
    bb_ref,     # (1, Hp)         f32   backbone bias
    w1_ref,     # (Hp, Hp)        bf16  head Linear #1 weight (resident)
    b1_ref,     # (1, Hp)         f32   head Linear #1 bias
    w2_ref,     # (Hp, Fp)        bf16  head Linear #2 weight (resident)
    b2_ref,     # (1, Fp)         f32   head Linear #2 bias
    o_ref,      # (TB, Fp)        f32   L2-normalized features
    acc_ref,    # (TB, Hp)        f32   backbone-matmul accumulator (scratch)
    *, tk, wb_resident,
):
    k = pl.program_id(1)

    # --- init accumulator at the start of the K reduction -------------------
    @pl.when(k == 0)
    def _():
        acc_ref[...] = jnp.zeros_like(acc_ref)

    # --- synthetic backbone matmul, K-tiled: acc += x_k @ wb_k --------------
    # TODO(synk): real DeepDPM uses an arbitrary user-provided backbone
    # (e.g. ResNet); only its output contract (B, backbone_dim) is modeled.
    x_tile = x_ref[...].astype(jnp.bfloat16)        # in-kernel cast (VPU filler)
    if wb_resident:
        off = pl.multiple_of(k * tk, tk)
        wb_tile = wb_ref[pl.ds(off, tk), :]          # slice of VMEM-resident wb
    else:
        wb_tile = wb_ref[...]                        # K-streamed tile
    acc_ref[...] += jnp.dot(x_tile, wb_tile, preferred_element_type=jnp.float32)

    # --- finalize: bias+ReLU, MLP head, L2 normalize -------------------------
    @pl.when(k == pl.num_programs(1) - 1)
    def _():
        h = jnp.maximum(acc_ref[...] + bb_ref[...], 0.0)

        # head == 'mlp': Linear -> ReLU -> Linear (bf16 MXU, f32 accumulate)
        h1 = jnp.dot(h.astype(jnp.bfloat16), w1_ref[...],
                     preferred_element_type=jnp.float32) + b1_ref[...]
        h1 = jnp.maximum(h1, 0.0)
        f = jnp.dot(h1.astype(jnp.bfloat16), w2_ref[...],
                    preferred_element_type=jnp.float32) + b2_ref[...]

        # F.normalize(features, dim=1): v / max(||v||_2, 1e-12)
        # rsqrt on the clamped squared norm == 1 / max(||v||, 1e-12); EUP path.
        sq = jnp.sum(f * f, axis=1, keepdims=True)
        inv = jax.lax.rsqrt(jnp.maximum(sq, 1e-24))
        o_ref[...] = (f * inv).astype(o_ref.dtype)


# ----------------------------------------------------------------------------
# Tiling / VMEM plan (computed once per (shapes, dims), reused every forward)
# ----------------------------------------------------------------------------
def make_plan(batch, d_in, backbone_dim, features_dim,
              vmem_budget_bytes=40 * 1024 * 1024):
    Hp = _round_up(backbone_dim, LANE)          # lane-dense hidden width
    Fp = _round_up(features_dim, LANE)          # lane-dense output width
    Dp128 = _round_up(d_in, LANE)

    # Batch tile: as large as possible (amortize ~0.35us/step + acc RMW),
    # multiple of 16 (bf16 sublanes), minimal batch padding, and prefer >= 2
    # batch tiles so both v7x TensorCores get work on the "parallel" axis.
    TB_max = min(512, _round_up(batch, SUB))
    best_key, TB = None, SUB
    for tb in range(TB_max, SUB - 1, -SUB):
        bp = _round_up(batch, tb)
        key = (bp - batch, 0 if bp // tb >= 2 else 1, -tb)
        if best_key is None or key < best_key:
            best_key, TB = key, tb

    # wb stays VMEM-resident (fetched from HBM exactly once) when small enough
    # (double-buffered bf16 copy <= 8 MiB, i.e. typical backbone_dim <= 512
    # with flattened image inputs); otherwise it is K-streamed.
    wb_resident = 2 * Dp128 * Hp * 2 <= 8 * 1024 * 1024

    # K tile: single step when the whole reduction fits, else large tiles
    # (up to 4096) chosen against the VMEM budget, preferring divisors of the
    # 128-padded D_in so x needs no feature padding (no wrapper pad pass).
    if Dp128 <= 4096:
        tk_cands = [Dp128]
    else:
        tk_cands = [4096, 3072, 2048, 1536, 1024, 512, 256, 128]

    def plan_bytes(tb, tk):
        dp = _round_up(Dp128, tk)
        b = 2 * tb * tk * 4                                        # x f32, 2 bufs
        b += 2 * (dp if wb_resident else tk) * Hp * 2              # wb bf16, 2 bufs
        b += 2 * ((Hp * Hp + Hp * Fp) * 2 + (2 * Hp + Fp) * 4)     # head (2 bufs)
        b += 2 * tb * Fp * 4                                       # out, 2 bufs
        b += tb * Hp * 4                                           # acc scratch
        return b

    fitting = [t for t in tk_cands if plan_bytes(TB, t) <= vmem_budget_bytes]
    if not fitting:
        fitting = [tk_cands[-1]]
    divisors = [t for t in fitting if Dp128 % t == 0]
    TK = divisors[0] if divisors else fitting[0]
    Dp = _round_up(Dp128, TK)

    # Scoped VMEM request derived from the plan; capped at 48 MiB so it stays
    # valid on v7x (64 MiB physical) as well as v5e/v6e (128 MiB).
    vmem_limit = min(48 * 1024 * 1024,
                     max(32 * 1024 * 1024, plan_bytes(TB, TK) + 8 * 1024 * 1024))

    return dict(d_in=d_in, backbone_dim=backbone_dim, features_dim=features_dim,
                Hp=Hp, Fp=Fp, Dp=Dp, TB=TB, TK=TK,
                wb_resident=wb_resident, vmem_limit=vmem_limit)


def prepare_params(params, plan):
    """Pad + cast weights to the kernel layout ONCE (not per forward call)."""
    Hp, Fp, Dp = plan["Hp"], plan["Fp"], plan["Dp"]
    H, F, D = plan["backbone_dim"], plan["features_dim"], plan["d_in"]
    return {
        "wb": jnp.pad(params["wb"], ((0, Dp - D), (0, Hp - H))).astype(jnp.bfloat16),
        "bb": jnp.pad(params["bb"], ((0, 0), (0, Hp - H))).astype(jnp.float32),
        "w1": jnp.pad(params["w1"], ((0, Hp - H), (0, Hp - H))).astype(jnp.bfloat16),
        "b1": jnp.pad(params["b1"], ((0, 0), (0, Hp - H))).astype(jnp.float32),
        "w2": jnp.pad(params["w2"], ((0, Hp - H), (0, Fp - F))).astype(jnp.bfloat16),
        "b2": jnp.pad(params["b2"], ((0, 0), (0, Fp - F))).astype(jnp.float32),
    }


# ----------------------------------------------------------------------------
# Forward
# ----------------------------------------------------------------------------
def contrastive_model_forward(x_nchw, kparams, plan):
    """x_nchw: (B, C, H, W) float32. kparams from prepare_params(). Returns (B, features_dim) f32."""
    B = x_nchw.shape[0]
    x_flat = x_nchw.reshape(B, -1)                 # flatten NCHW (free reshape)
    D_in = x_flat.shape[1]
    assert D_in == plan["d_in"]

    Hp, Fp, Dp = plan["Hp"], plan["Fp"], plan["Dp"]
    TB, TK = plan["TB"], plan["TK"]
    F_dim = plan["features_dim"]
    wb_resident = plan["wb_resident"]

    Bp = _round_up(B, TB)
    # x stays f32 (bf16 cast happens in-kernel -> no extra HBM pass); pad only
    # when a batch/feature remainder actually exists.
    if Bp != B or Dp != D_in:
        x_flat = jnp.pad(x_flat, ((0, Bp - B), (0, Dp - D_in)))

    nb = Bp // TB
    nk = Dp // TK

    if wb_resident:
        # Full-array block + constant index map: DMA'd from HBM exactly once.
        wb_spec = pl.BlockSpec((Dp, Hp), lambda i, k: (0, 0))
    else:
        # K-streamed (re-streamed once per batch tile).
        wb_spec = pl.BlockSpec((TK, Hp), lambda i, k: (k, 0))

    wbp, w1p, w2p = kparams["wb"], kparams["w1"], kparams["w2"]
    flops = 2 * Bp * (Dp * Hp + Hp * Hp + Hp * Fp)
    bytes_accessed = (
        Bp * Dp * 4                                      # x (f32), streamed once
        + wbp.size * 2 * (1 if wb_resident else nb)      # wb re-streamed per batch tile when not resident
        + (w1p.size + w2p.size) * 2
        + (kparams["bb"].size + kparams["b1"].size + kparams["b2"].size) * 4
        + Bp * Fp * 4)                                   # output

    kernel = functools.partial(_contrastive_kernel, tk=TK, wb_resident=wb_resident)

    out = pl.pallas_call(
        kernel,
        out_shape=jax.ShapeDtypeStruct((Bp, Fp), jnp.float32),
        grid=(nb, nk),
        in_specs=[
            pl.BlockSpec((TB, TK), lambda i, k: (i, k)),   # x   (K-pipelined)
            wb_spec,                                       # wb  (resident or streamed)
            pl.BlockSpec((1, Hp),  lambda i, k: (0, 0)),   # bb  (resident)
            pl.BlockSpec((Hp, Hp), lambda i, k: (0, 0)),   # w1  (resident)
            pl.BlockSpec((1, Hp),  lambda i, k: (0, 0)),   # b1  (resident)
            pl.BlockSpec((Hp, Fp), lambda i, k: (0, 0)),   # w2  (resident)
            pl.BlockSpec((1, Fp),  lambda i, k: (0, 0)),   # b2  (resident)
        ],
        out_specs=pl.BlockSpec((TB, Fp), lambda i, k: (i, 0)),
        scratch_shapes=[pltpu.VMEM((TB, Hp), jnp.float32)],
        compiler_params=pltpu.CompilerParams(
            # batch axis parallel (2 TCs on v7x), K reduction axis arbitrary.
            dimension_semantics=("parallel", "arbitrary"),
            vmem_limit_bytes=plan["vmem_limit"],
        ),
        cost_estimate=pl.CostEstimate(
            flops=flops, transcendentals=Bp, bytes_accessed=bytes_accessed,
        ),
    )(x_flat, kparams["wb"], kparams["bb"], kparams["w1"],
      kparams["b1"], kparams["w2"], kparams["b2"])

    # slice away batch / feature padding
    return out[:B, :F_dim]


# ----------------------------------------------------------------------------
# Params / reference
# ----------------------------------------------------------------------------
def init_params(key, in_dim, backbone_dim, features_dim):
    ks = jax.random.split(key, 6)
    s = 0.02
    return {
        "wb": (s * jax.random.normal(ks[0], (in_dim, backbone_dim))).astype(jnp.float32),
        "bb": (s * jax.random.normal(ks[1], (1, backbone_dim))).astype(jnp.float32),
        "w1": (s * jax.random.normal(ks[2], (backbone_dim, backbone_dim))).astype(jnp.float32),
        "b1": (s * jax.random.normal(ks[3], (1, backbone_dim))).astype(jnp.float32),
        "w2": (s * jax.random.normal(ks[4], (backbone_dim, features_dim))).astype(jnp.float32),
        "b2": (s * jax.random.normal(ks[5], (1, features_dim))).astype(jnp.float32),
    }


def _reference(x_nchw, p):
    """Pure-JAX f32 reference for a sanity check."""
    x = x_nchw.reshape(x_nchw.shape[0], -1)
    h = jnp.maximum(x @ p["wb"] + p["bb"], 0.0)
    h = jnp.maximum(h @ p["w1"] + p["b1"], 0.0)
    f = h @ p["w2"] + p["b2"]
    n = jnp.sqrt(jnp.sum(f * f, axis=1, keepdims=True))
    return f / jnp.maximum(n, 1e-12)


if __name__ == "__main__":
    # Small shapes consistent with the module's forward contract.
    B, C, H, W = 2, 4, 16, 16          # NCHW image input
    backbone_dim = 32                   # backbone['dim']
    features_dim = 128                  # ContrastiveModel default

    key = jax.random.PRNGKey(0)
    kx, kp = jax.random.split(key)
    x = jax.random.normal(kx, (B, C, H, W), dtype=jnp.float32)
    params = init_params(kp, C * H * W, backbone_dim, features_dim)

    # Plan tiling once, convert/pad weights once (not per forward call).
    plan = make_plan(B, C * H * W, backbone_dim, features_dim)
    kparams = prepare_params(params, plan)

    @jax.jit
    def fwd(x_in, kp_):
        return contrastive_model_forward(x_in, kp_, plan)

    out = jax.block_until_ready(fwd(x, kparams))
    ref = jax.block_until_ready(_reference(x, params))

    assert out.shape == (B, features_dim)
    # bf16 MXU inputs with f32 accumulation: compare against f32 reference
    # with a relaxed tolerance.
    assert jnp.allclose(out, ref, atol=3e-2, rtol=3e-2), float(
        jnp.max(jnp.abs(out - ref))
    )
    # rows should be unit-norm (normalization is done fully in f32 in-kernel)
    assert jnp.allclose(jnp.linalg.norm(out, axis=1), 1.0, atol=1e-4)

    print("KERNEL_OK")
</pallas_src>

<mosaic_0001>
module attributes {stable_mosaic.version = 11 : i64} {
  func.func @_contrastive_kernel(%arg0: i32, %arg1: i32, %arg2: memref<16x1024xf32, #tpu.memory_space<vmem>>, %arg3: memref<1024x128xbf16, #tpu.memory_space<vmem>>, %arg4: memref<1x128xf32, #tpu.memory_space<vmem>>, %arg5: memref<128x128xbf16, #tpu.memory_space<vmem>>, %arg6: memref<1x128xf32, #tpu.memory_space<vmem>>, %arg7: memref<128x128xbf16, #tpu.memory_space<vmem>>, %arg8: memref<1x128xf32, #tpu.memory_space<vmem>>, %arg9: memref<16x128xf32, #tpu.memory_space<vmem>>, %arg10: memref<16x128xf32, #tpu.memory_space<vmem>>) attributes {dimension_semantics = [#tpu.dimension_semantics<parallel>, #tpu.dimension_semantics<arbitrary>], iteration_bounds = array<i64: 1, 1>, scalar_prefetch = 0 : i64, scratch_operands = 1 : i64, tpu.core_type = #tpu.core_type<tc>, window_params = [{transform_indices = @transform_0, window_bounds = array<i64: 16, 1024>}, {pipeline_mode = #tpu.pipeline_mode<synchronous>, transform_indices = @transform_1, window_bounds = array<i64: 1024, 128>}, {pipeline_mode = #tpu.pipeline_mode<synchronous>, transform_indices = @transform_2, window_bounds = array<i64: 1, 128>}, {pipeline_mode = #tpu.pipeline_mode<synchronous>, transform_indices = @transform_3, window_bounds = array<i64: 128, 128>}, {pipeline_mode = #tpu.pipeline_mode<synchronous>, transform_indices = @transform_4, window_bounds = array<i64: 1, 128>}, {pipeline_mode = #tpu.pipeline_mode<synchronous>, transform_indices = @transform_5, window_bounds = array<i64: 128, 128>}, {pipeline_mode = #tpu.pipeline_mode<synchronous>, transform_indices = @transform_6, window_bounds = array<i64: 1, 128>}, {transform_indices = @transform_7, window_bounds = array<i64: 16, 128>}]} {
    %c0_i32 = arith.constant 0 : i32
    %0 = arith.cmpi eq, %arg1, %c0_i32 : i32
    %1 = arith.extui %0 : i1 to i32
    %c0_i32_0 = arith.constant 0 : i32
    %2 = arith.cmpi ne, %1, %c0_i32_0 : i32
    scf.if %2 {
      %cst_9 = arith.constant 0.000000e+00 : f32
      %16 = vector.broadcast %cst_9 : f32 to vector<16x128xf32>
      %c0_10 = arith.constant 0 : index
      %c0_11 = arith.constant 0 : index
      %17 = vector.load %arg10[%c0_10, %c0_11] : memref<16x128xf32, #tpu.memory_space<vmem>>, vector<16x128xf32>
      tpu.vector_store %arg10[%c0_10, %c0_11], %16 {strides = array<i32>} : memref<16x128xf32, #tpu.memory_space<vmem>>, vector<16x128xf32>,
    } else {
    }
    %c0 = arith.constant 0 : index
    %c0_1 = arith.constant 0 : index
    %3 = vector.load %arg2[%c0, %c0_1] : memref<16x1024xf32, #tpu.memory_space<vmem>>, vector<16x1024xf32>
    %4 = arith.truncf %3 : vector<16x1024xf32> to vector<16x1024xbf16>
    %c1024_i32 = arith.constant 1024 : i32
    %5 = arith.muli %arg1, %c1024_i32 : i32
    %6 = tpu.assume_multiple %5, 1024 : i32
    %7 = arith.index_cast %6 : i32 to index
    %c0_2 = arith.constant 0 : index
    %8 = vector.load %arg3[%7, %c0_2] : memref<1024x128xbf16, #tpu.memory_space<vmem>>, vector<1024x128xbf16>
    %c0_3 = arith.constant 0 : index
    %c0_4 = arith.constant 0 : index
    %9 = vector.load %arg10[%c0_3, %c0_4] : memref<16x128xf32, #tpu.memory_space<vmem>>, vector<16x128xf32>
    %cst = arith.constant dense<0.000000e+00> : vector<16x128xf32>
    %10 = tpu.matmul %4, %8, %cst {dimension_numbers = #tpu.dot_dimension_numbers<[1], [0], [0], [1], [0, 0, 1, 1], [], []>} : vector<16x1024xbf16>, vector<1024x128xbf16>, vector<16x128xf32> -> vector<16x128xf32>
    %11 = arith.addf %9, %10 : vector<16x128xf32>
    %c0_5 = arith.constant 0 : index
    %c0_6 = arith.constant 0 : index
    %12 = vector.load %arg10[%c0_5, %c0_6] : memref<16x128xf32, #tpu.memory_space<vmem>>, vector<16x128xf32>
    tpu.vector_store %arg10[%c0_5, %c0_6], %11 {strides = array<i32>} : memref<16x128xf32, #tpu.memory_space<vmem>>, vector<16x128xf32>,
    %c0_i32_7 = arith.constant 0 : i32
    %13 = arith.cmpi eq, %arg1, %c0_i32_7 : i32
    %14 = arith.extui %13 : i1 to i32
    %c0_i32_8 = arith.constant 0 : i32
    %15 = arith.cmpi ne, %14, %c0_i32_8 : i32
    scf.if %15 {
      %c0_9 = arith.constant 0 : index
      %c0_10 = arith.constant 0 : index
      %16 = vector.load %arg10[%c0_9, %c0_10] : memref<16x128xf32, #tpu.memory_space<vmem>>, vector<16x128xf32>
      %c0_11 = arith.constant 0 : index
      %c0_12 = arith.constant 0 : index
      %17 = vector.load %arg4[%c0_11, %c0_12] : memref<1x128xf32, #tpu.memory_space<vmem>>, vector<1x128xf32>
      %18 = vector.broadcast %17 : vector<1x128xf32> to vector<16x128xf32>
      %19 = arith.addf %16, %18 : vector<16x128xf32>
      %cst_13 = arith.constant 0.000000e+00 : f32
      %20 = vector.broadcast %cst_13 : f32 to vector<16x128xf32>
      %21 = arith.maximumf %19, %20 : vector<16x128xf32>
      %22 = arith.truncf %21 : vector<16x128xf32> to vector<16x128xbf16>
      %c0_14 = arith.constant 0 : index
      %c0_15 = arith.constant 0 : index
      %23 = vector.load %arg5[%c0_14, %c0_15] : memref<128x128xbf16, #tpu.memory_space<vmem>>, vector<128x128xbf16>
      %cst_16 = arith.constant dense<0.000000e+00> : vector<16x128xf32>
      %24 = tpu.matmul %22, %23, %cst_16 {dimension_numbers = #tpu.dot_dimension_numbers<[1], [0], [0], [1], [0, 0, 1, 1], [], []>} : vector<16x128xbf16>, vector<128x128xbf16>, vector<16x128xf32> -> vector<16x128xf32>
      %c0_17 = arith.constant 0 : index
      %c0_18 = arith.constant 0 : index
      %25 = vector.load %arg6[%c0_17, %c0_18] : memref<1x128xf32, #tpu.memory_space<vmem>>, vector<1x128xf32>
      %26 = vector.broadcast %25 : vector<1x128xf32> to vector<16x128xf32>
      %27 = arith.addf %24, %26 : vector<16x128xf32>
      %cst_19 = arith.constant 0.000000e+00 : f32
      %28 = vector.broadcast %cst_19 : f32 to vector<16x128xf32>
      %29 = arith.maximumf %27, %28 : vector<16x128xf32>
      %30 = arith.truncf %29 : vector<16x128xf32> to vector<16x128xbf16>
      %c0_20 = arith.constant 0 : index
      %c0_21 = arith.constant 0 : index
      %31 = vector.load %arg7[%c0_20, %c0_21] : memref<128x128xbf16, #tpu.memory_space<vmem>>, vector<128x128xbf16>
      %cst_22 = arith.constant dense<0.000000e+00> : vector<16x128xf32>
      %32 = tpu.matmul %30, %31, %cst_22 {dimension_numbers = #tpu.dot_dimension_numbers<[1], [0], [0], [1], [0, 0, 1, 1], [], []>} : vector<16x128xbf16>, vector<128x128xbf16>, vector<16x128xf32> -> vector<16x128xf32>
      %c0_23 = arith.constant 0 : index
      %c0_24 = arith.constant 0 : index
      %33 = vector.load %arg8[%c0_23, %c0_24] : memref<1x128xf32, #tpu.memory_space<vmem>>, vector<1x128xf32>
      %34 = vector.broadcast %33 : vector<1x128xf32> to vector<16x128xf32>
      %35 = arith.addf %32, %34 : vector<16x128xf32>
      %36 = arith.mulf %35, %35 : vector<16x128xf32>
      %cst_25 = arith.constant dense<0.000000e+00> : vector<16xf32>
      %37 = vector.multi_reduction <add>, %36, %cst_25 [1] : vector<16x128xf32> to vector<16xf32>
      %38 = vector.shape_cast %37 : vector<16xf32> to vector<16x1xf32>
      %cst_26 = arith.constant 1.000000e-24 : f32
      %39 = vector.broadcast %cst_26 : f32 to vector<16x1xf32>
      %40 = arith.maximumf %38, %39 : vector<16x1xf32>
      %41 = math.rsqrt %40 : vector<16x1xf32>
      %42 = vector.broadcast %41 : vector<16x1xf32> to vector<16x128xf32>
      %43 = arith.mulf %35, %42 : vector<16x128xf32>
      %c0_27 = arith.constant 0 : index
      %c0_28 = arith.constant 0 : index
      %44 = vector.load %arg9[%c0_27, %c0_28] : memref<16x128xf32, #tpu.memory_space<vmem>>, vector<16x128xf32>
      tpu.vector_store %arg9[%c0_27, %c0_28], %43 {strides = array<i32>} : memref<16x128xf32, #tpu.memory_space<vmem>>, vector<16x128xf32>,
    } else {
    }
    return
  }
  func.func @transform_0(%arg0: i32, %arg1: i32) -> (i32, i32) {
    %c0_i32 = arith.constant 0 : i32
    return %arg0, %arg1 : i32, i32
  }
  func.func @transform_1(%arg0: i32, %arg1: i32) -> (i32, i32) {
    %c0_i32 = arith.constant 0 : i32
    %c0_i32_0 = arith.constant 0 : i32
    %c0_i32_1 = arith.constant 0 : i32
    return %c0_i32, %c0_i32_0 : i32, i32
  }
  func.func @transform_2(%arg0: i32, %arg1: i32) -> (i32, i32) {
    %c0_i32 = arith.constant 0 : i32
    %c0_i32_0 = arith.constant 0 : i32
    %c0_i32_1 = arith.constant 0 : i32
    return %c0_i32, %c0_i32_0 : i32, i32
  }
  func.func @transform_3(%arg0: i32, %arg1: i32) -> (i32, i32) {
    %c0_i32 = arith.constant 0 : i32
    %c0_i32_0 = arith.constant 0 : i32
    %c0_i32_1 = arith.constant 0 : i32
    return %c0_i32, %c0_i32_0 : i32, i32
  }
  func.func @transform_4(%arg0: i32, %arg1: i32) -> (i32, i32) {
    %c0_i32 = arith.constant 0 : i32
    %c0_i32_0 = arith.constant 0 : i32
    %c0_i32_1 = arith.constant 0 : i32
    return %c0_i32, %c0_i32_0 : i32, i32
  }
  func.func @transform_5(%arg0: i32, %arg1: i32) -> (i32, i32) {
    %c0_i32 = arith.constant 0 : i32
    %c0_i32_0 = arith.constant 0 : i32
    %c0_i32_1 = arith.constant 0 : i32
    return %c0_i32, %c0_i32_0 : i32, i32
  }
  func.func @transform_6(%arg0: i32, %arg1: i32) -> (i32, i32) {
    %c0_i32 = arith.constant 0 : i32
    %c0_i32_0 = arith.constant 0 : i32
    %c0_i32_1 = arith.constant 0 : i32
    return %c0_i32, %c0_i32_0 : i32, i32
  }
  func.func @transform_7(%arg0: i32, %arg1: i32) -> (i32, i32) {
    %c0_i32 = arith.constant 0 : i32
    %c0_i32_0 = arith.constant 0 : i32
    return %arg0, %c0_i32 : i32, i32
  }
}

</mosaic_0001>

<bundles_post_ra>
// kernel: fwd.1
= control target key start
LH: loop header
LB: loop body
LE: loop exit
PB: predicated region body
PF: predicated region fallthrough
CT: control target
= control target key end

     0   :  { %12 = vsyncpa [#allocation4], 0  ;;  %s1365_s24 = smov [#allocation3]   ;;  %s1551_s0 = inlined_call_operand.vmem [shape: f32[16,1024], index: 0, kind: input, shape index: {}]   ;;  %s1552_s1 = inlined_call_operand.hbm [shape: bf16[1024,128], index: 1, kind: input, shape index: {}]   ;;  %s1553_s2 = inlined_call_operand.vmem [shape: f32[1,128], index: 2, kind: input, shape index: {}]   ;;  %s1554_s3 = inlined_call_operand.vmem [shape: bf16[128,128], index: 3, kind: input, shape index: {}]   ;;  %s1555_s4 = inlined_call_operand.vmem [shape: f32[1,128], index: 4, kind: input, shape index: {}]   ;;  %s1556_s5 = inlined_call_operand.vmem [shape: bf16[128,128], index: 5, kind: input, shape index: {}]   ;;  %s1557_s6 = inlined_call_operand.vmem [shape: f32[1,128], index: 6, kind: input, shape index: {}]   ;;  %s1558_s7 = inlined_call_operand.vmem [shape: f32[16,128], index: 7, kind: output, shape index: {}]  }
   0x1   :  { %s20_s25 = sshll.u32 %s1365_s24, 4  ;;  %s1341_s28 = scalar_lea.hbm %s1552_s1, 8192  ;;  %s21_s25 = int_to_ptr.vmem [resolvable:$true] %s20_s25 }
   0x2   :  { %p1342_p0 = scmp.ne.s32.totalorder %s1552_s1, %s1341_s28  ;;  %p1345_p1 = scmp.lt.u32.totalorder %s1341_s28, %s1552_s1 }
   0x4   :  { %p1347_p2 = pnand %p1345_p1, %p1342_p0 }
   0x6   :  { %1350 = shalt.err (!%p1347_p2)
}
   0x7   :  { %s1351_s10 = scalar_lea.vmem %s21_s25, 8192  ;;  %p1356_p4 = scmp.lt.s32.totalorder %s21_s25, %s21_s25 }
   0x8   :  { %p1352_p3 = scmp.ne.s32.totalorder %s21_s25, %s1351_s10  ;;  %p1357_p5 = scmp.lt.s32.totalorder %s1351_s10, %s1351_s10 }
   0xa   :  { %p1358_p6 = por %p1357_p5, %p1356_p4 }
   0xc   :  { %p1359_p7 = pnand %p1358_p6, %p1352_p3 }
   0xe   :  { %1362 = shalt.err (!%p1359_p7)
}
   0xf   :  { %s1366_s11 = smov 64   ;;  %s1367_s12 = smov 4  }
  0x10   :  { %26 = dma.hbm_to_vmem [thread:$0]  %s1552_s1, 8192, %s21_s25, [#allocation4], %s1366_s11, %s1366_s11, %s1367_s12  }
  0x11   :  { %1363 = dma.done.wait [#allocation4], 8192  }
  0x12   :  { %1364 = vsyncadd [#allocation4], 4294959104  ;;  %v1257_v0 = vld [vmem:[#allocation3 + $0x40] sm:$0xff]   ;;  %v1261_v4 = vld [vmem:[#allocation3 + $0x48] sm:$0xff]   ;;  %vm1369_vm0 = vmmov 0  }
  0x13   :  { %v1258_v1 = vld [vmem:[#allocation3 + $0xc0] sm:$0xff]   ;;  %1106 = vmatprep.subr.bf16.mxu0 %v1257_v0  ;;  %v1262_v5 = vld [vmem:[#allocation3 + $0xc8] sm:$0xff]   ;;  %v1265_v8 = vld [vmem:[#allocation3 + $0x50] sm:$0xff]  }
  0x14   :  { %v1259_v2 = vld [vmem:[#allocation3] sm:$0xff]   ;;  %1128 = vmatprep.subr.bf16.mxu1 %v1258_v1  ;;  %v1263_v6 = vld [vmem:[#allocation3 + $0x8] sm:$0xff]   ;;  %v1266_v9 = vld [vmem:[#allocation3 + $0xd0] sm:$0xff]  }
  0x15   :  { %v1260_v3 = vld [vmem:[#allocation3 + $0x80] sm:$0xff]   ;;  %1107 = vmatpush3.bf16.msra.mxu0 %v1259_v2  ;;  %v1264_v7 = vld [vmem:[#allocation3 + $0x88] sm:$0xff]   ;;  %v1267_v10 = vld [vmem:[#allocation3 + $0x10] sm:$0xff]  }
  0x16   :  { %1129 = vmatpush3.bf16.msra.mxu1 %v1260_v3  ;;  %1108 = vmatprep.subr.bf16.mxu0 %v1261_v4  ;;  %v1268_v11 = vld [vmem:[#allocation3 + $0x90] sm:$0xff]   ;;  %v1269_v12 = vld [vmem:[#allocation3 + $0x58] sm:$0xff]   ;;  %v1273_v16 = vld [vmem:[#allocation3 + $0x60] sm:$0xff]  }
  0x17   :  { %1130 = vmatprep.subr.bf16.mxu1 %v1262_v5  ;;  %v1270_v13 = vld [vmem:[#allocation3 + $0xd8] sm:$0xff]   ;;  %v1274_v17 = vld [vmem:[#allocation3 + $0xe0] sm:$0xff]   ;;  %v1277_v20 = vld [vmem:[#allocation3 + $0x68] sm:$0xff]  }
  0x18   :  { %v1271_v14 = vld [vmem:[#allocation3 + $0x18] sm:$0xff]   ;;  %v1275_v18 = vld [vmem:[#allocation3 + $0x20] sm:$0xff]   ;;  %v1278_v21 = vld [vmem:[#allocation3 + $0xe8] sm:$0xff]  }
  0x19   :  { %1109 = vmatpush3.bf16.msra.mxu0 %v1263_v6  ;;  %v1272_v15 = vld [vmem:[#allocation3 + $0x98] sm:$0xff]   ;;  %v1276_v19 = vld [vmem:[#allocation3 + $0xa0] sm:$0xff]   ;;  %v1279_v22 = vld [vmem:[#allocation3 + $0x28] sm:$0xff]  }
  0x1a   :  { %1131 = vmatpush3.bf16.msra.mxu1 %v1264_v7  ;;  %1110 = vmatprep.subr.bf16.mxu0 %v1265_v8  ;;  %v1280_v23 = vld [vmem:[#allocation3 + $0xa8] sm:$0xff]   ;;  %v1281_v24 = vld [vmem:[#allocation3 + $0x70] sm:$0xff]   ;;  %v1285_v28 = vld [vmem:[#allocation3 + $0x78] sm:$0xff]  }
  0x1b   :  { %1132 = vmatprep.subr.bf16.mxu1 %v1266_v9  ;;  %v1282_v25 = vld [vmem:[#allocation3 + $0xf0] sm:$0xff]   ;;  %v1286_v29 = vld [vmem:[#allocation3 + $0xf8] sm:$0xff]   ;;  %v48_v32 = vld [vmem:[%s1551_s0 + $0x8] sm:$0xff] }
  0x1c   :  { %v1283_v26 = vld [vmem:[#allocation3 + $0x30] sm:$0xff]   ;;  %v1287_v30 = vld [vmem:[#allocation3 + $0x38] sm:$0xff]   ;;  %v56_v33 = vld [vmem:[%s1551_s0 + $0x48] sm:$0xff] }
  0x1d   :  { %1111 = vmatpush3.bf16.msra.mxu0 %v1267_v10  ;;  %v1284_v27 = vld [vmem:[#allocation3 + $0xb0] sm:$0xff]   ;;  %v1288_v31 = vld [vmem:[#allocation3 + $0xb8] sm:$0xff]   ;;  %v64_v35 = vpack.c.bf16 %v56_v33, %v48_v32  ;;  %v47_v37 = vld [vmem:[%s1551_s0] sm:$0xff] }
  0x1e   :  { %1133 = vmatpush3.bf16.msra.mxu1 %v1268_v11  ;;  %1112 = vmatprep.subr.bf16.mxu0 %v1269_v12  ;;  %v50_v34 = vld [vmem:[%s1551_s0 + $0x18] sm:$0xff]  ;;  %v55_v38 = vld [vmem:[%s1551_s0 + $0x40] sm:$0xff]  ;;  %v49_v41 = vld [vmem:[%s1551_s0 + $0x10] sm:$0xff] }
  0x1f   :  { %1134 = vmatprep.subr.bf16.mxu1 %v1270_v13  ;;  %v58_v36 = vld [vmem:[%s1551_s0 + $0x58] sm:$0xff]  ;;  %v63_v40 = vpack.c.bf16 %v55_v38, %v47_v37  ;;  %v57_v42 = vld [vmem:[%s1551_s0 + $0x50] sm:$0xff]  ;;  %622 = vmatprep.mubr.bf16.mxu0 %v64_v35  ;;  %v1289_v44 = vld [vmem:[#allocation3 + $0x140] sm:$0xff]  }
  0x20   :  { %v66_v39 = vpack.c.bf16 %v58_v36, %v50_v34  ;;  %v65_v43 = vpack.c.bf16 %v57_v42, %v49_v41  ;;  %v1290_v45 = vld [vmem:[#allocation3 + $0x1c0] sm:$0xff]   ;;  %v1293_v48 = vld [vmem:[#allocation3 + $0x148] sm:$0xff]   ;;  %v1297_v52 = vld [vmem:[#allocation3 + $0x150] sm:$0xff]  }
  0x21   :  { %1113 = vmatpush3.bf16.msra.mxu0 %v1271_v14  ;;  %v1291_v46 = vld [vmem:[#allocation3 + $0x100] sm:$0xff]   ;;  %v1294_v49 = vld [vmem:[#allocation3 + $0x1c8] sm:$0xff]   ;;  %v1298_v53 = vld [vmem:[#allocation3 + $0x1d0] sm:$0xff]  }
  0x22   :  { %1135 = vmatpush3.bf16.msra.mxu1 %v1272_v15  ;;  %1114 = vmatprep.subr.bf16.mxu0 %v1273_v16  ;;  %v1292_v47 = vld [vmem:[#allocation3 + $0x180] sm:$0xff]   ;;  %v1295_v50 = vld [vmem:[#allocation3 + $0x108] sm:$0xff]   ;;  %v1299_v54 = vld [vmem:[#allocation3 + $0x110] sm:$0xff]  }
  0x23   :  { %1136 = vmatprep.subr.bf16.mxu1 %v1274_v17  ;;  %663 = vmatprep.mubr.bf16.mxu1 %v66_v39  ;;  %v1296_v51 = vld [vmem:[#allocation3 + $0x188] sm:$0xff]   ;;  %v1300_v55 = vld [vmem:[#allocation3 + $0x190] sm:$0xff]   ;;  %v1301_v56 = vld [vmem:[#allocation3 + $0x158] sm:$0xff]  }
  0x24   :  { %v1302_v57 = vld [vmem:[#allocation3 + $0x1d8] sm:$0xff]   ;;  %v1305_v60 = vld [vmem:[#allocation3 + $0x160] sm:$0xff]   ;;  %v1309_v0 = vld [vmem:[#allocation3 + $0x168] sm:$0xff]  }
  0x25   :  { %1115 = vmatpush3.bf16.msra.mxu0 %v1275_v18  ;;  %v1303_v58 = vld [vmem:[#allocation3 + $0x118] sm:$0xff]   ;;  %v1306_v61 = vld [vmem:[#allocation3 + $0x1e0] sm:$0xff]   ;;  %v1310_v1 = vld [vmem:[#allocation3 + $0x1e8] sm:$0xff]  }
  0x26   :  { %1137 = vmatpush3.bf16.msra.mxu1 %v1276_v19  ;;  %1116 = vmatprep.subr.bf16.mxu0 %v1277_v20  ;;  %v1304_v59 = vld [vmem:[#allocation3 + $0x198] sm:$0xff]   ;;  %v1307_v62 = vld [vmem:[#allocation3 + $0x120] sm:$0xff]   ;;  %v1311_v2 = vld [vmem:[#allocation3 + $0x128] sm:$0xff]  }
  0x27   :  { %1138 = vmatprep.subr.bf16.mxu1 %v1278_v21  ;;  %v1308_v63 = vld [vmem:[#allocation3 + $0x1a0] sm:$0xff]   ;;  %v1312_v3 = vld [vmem:[#allocation3 + $0x1a8] sm:$0xff]   ;;  %v1313_v4 = vld [vmem:[#allocation3 + $0x170] sm:$0xff]  }
  0x28   :  { %v1314_v5 = vld [vmem:[#allocation3 + $0x1f0] sm:$0xff]   ;;  %v1317_v8 = vld [vmem:[#allocation3 + $0x178] sm:$0xff]   ;;  %v52_v12 = vld [vmem:[%s1551_s0 + $0x28] sm:$0xff] }
  0x29   :  { %1117 = vmatpush3.bf16.msra.mxu0 %v1279_v22  ;;  %v1315_v6 = vld [vmem:[#allocation3 + $0x130] sm:$0xff]   ;;  %v1318_v9 = vld [vmem:[#allocation3 + $0x1f8] sm:$0xff]   ;;  %v60_v13 = vld [vmem:[%s1551_s0 + $0x68] sm:$0xff] }
  0x2a   :  { %1139 = vmatpush3.bf16.msra.mxu1 %v1280_v23  ;;  %1118 = vmatprep.subr.bf16.mxu0 %v1281_v24  ;;  %v1316_v7 = vld [vmem:[#allocation3 + $0x1b0] sm:$0xff]   ;;  %v1319_v10 = vld [vmem:[#allocation3 + $0x138] sm:$0xff]   ;;  %v68_v16 = vpack.c.bf16 %v60_v13, %v52_v12  ;;  %v51_v18 = vld [vmem:[%s1551_s0 + $0x20] sm:$0xff] }
  0x2b   :  { %1140 = vmatprep.subr.bf16.mxu1 %v1282_v25  ;;  %v1320_v11 = vld [vmem:[#allocation3 + $0x1b8] sm:$0xff]   ;;  %v59_v19 = vld [vmem:[%s1551_s0 + $0x60] sm:$0xff]  ;;  %v53_v20 = vld [vmem:[%s1551_s0 + $0x30] sm:$0xff]  ;;  %v1368_v25 = vmov 0.0  }
  0x2c   :  { %v54_v14 = vld [vmem:[%s1551_s0 + $0x38] sm:$0xff]  ;;  %v67_v21 = vpack.c.bf16 %v59_v19, %v51_v18  ;;  %v61_v22 = vld [vmem:[%s1551_s0 + $0x70] sm:$0xff]  ;;  %v1321_v24 = vld [vmem:[%s1554_s3] sm:$0xff]  }
  0x2d   :  { %1119 = vmatpush3.bf16.msra.mxu0 %v1283_v26  ;;  %v62_v15 = vld [vmem:[%s1551_s0 + $0x78] sm:$0xff]  ;;  %v69_v23 = vpack.c.bf16 %v61_v22, %v53_v20  ;;  %v1322_v26 = vld [vmem:[%s1554_s3 + $0x8] sm:$0xff]   ;;  %v1329_v33 = vld [vmem:[%s1556_s5] sm:$0xff]  }
  0x2e   :  { %1141 = vmatpush3.bf16.msra.mxu1 %v1284_v27  ;;  %1120 = vmatprep.subr.bf16.mxu0 %v1285_v28  ;;  %v70_v17 = vpack.c.bf16 %v62_v15, %v54_v14  ;;  %v1323_v27 = vld [vmem:[%s1554_s3 + $0x10] sm:$0xff]   ;;  %v1324_v28 = vld [vmem:[%s1554_s3 + $0x18] sm:$0xff]   ;;  %v1330_v34 = vld [vmem:[%s1556_s5 + $0x8] sm:$0xff]  }
  0x2f   :  { %1142 = vmatprep.subr.bf16.mxu1 %v1286_v29  ;;  %v1325_v29 = vld [vmem:[%s1554_s3 + $0x20] sm:$0xff]   ;;  %v1328_v32 = vld [vmem:[%s1554_s3 + $0x38] sm:$0xff]   ;;  %v1331_v35 = vld [vmem:[%s1556_s5 + $0x10] sm:$0xff]  }
  0x30   :  { %v1332_v36 = vld [vmem:[%s1556_s5 + $0x18] sm:$0xff]   ;;  %v1333_v37 = vld [vmem:[%s1556_s5 + $0x20] sm:$0xff]   ;;  %v1334_v38 = vld [vmem:[%s1556_s5 + $0x28] sm:$0xff]  }
  0x31   :  { %1121 = vmatpush3.bf16.msra.mxu0 %v1287_v30  ;;  %v1326_v30 = vld [vmem:[%s1554_s3 + $0x28] sm:$0xff]   ;;  %v1336_v12 = vld [vmem:[%s1556_s5 + $0x38] sm:$0xff]   ;;  %v1088_v13 = vld [vmem:[%s1555_s4] ss:$0 sm:$0xff] }
  0x32   :  { %1143 = vmatpush3.bf16.msra.mxu1 %v1288_v31  ;;  %1150 = vmatprep.subr.bf16.mxu0 %v1289_v44  ;;  %v1327_v31 = vld [vmem:[%s1554_s3 + $0x30] sm:$0xff]  }
  0x33   :  { %1172 = vmatprep.subr.bf16.mxu1 %v1290_v45 }
  0x34   :  { %623 = vmatmul.mubr.bf16.vlgmr.msra.gmra.mrb[0].mxu0 %v63_v40 }
  0x35   :  { %664 = vmatmul.mubr.bf16.vlgmr.msra.gmra.mrb[0].mxu1 %v65_v43  ;;  %1151 = vmatpush3.bf16.msra.mxu0 %v1291_v46 }
  0x36   :  { %1173 = vmatpush3.bf16.msra.mxu1 %v1292_v47  ;;  %1152 = vmatprep.subr.bf16.mxu0 %v1293_v48 }
  0x37   :  { %1174 = vmatprep.subr.bf16.mxu1 %v1294_v49  ;;  %704 = vmatprep.mubr.bf16.mxu0 %v68_v16 }
  0x38   :  { %745 = vmatprep.mubr.bf16.mxu1 %v70_v17 }
  0x39   :  { %1153 = vmatpush3.bf16.msra.mxu0 %v1295_v50 }
  0x3a   :  { %1175 = vmatpush3.bf16.msra.mxu1 %v1296_v51  ;;  %1154 = vmatprep.subr.bf16.mxu0 %v1297_v52 }
  0x3b   :  { %1176 = vmatprep.subr.bf16.mxu1 %v1298_v53 }
  0x3d   :  { %1155 = vmatpush3.bf16.msra.mxu0 %v1299_v54 }
  0x3e   :  { %1177 = vmatpush3.bf16.msra.mxu1 %v1300_v55  ;;  %1156 = vmatprep.subr.bf16.mxu0 %v1301_v56 }
  0x3f   :  { %1178 = vmatprep.subr.bf16.mxu1 %v1302_v57 }
  0x41   :  { %1157 = vmatpush3.bf16.msra.mxu0 %v1303_v58 }
  0x42   :  { %1179 = vmatpush3.bf16.msra.mxu1 %v1304_v59  ;;  %1158 = vmatprep.subr.bf16.mxu0 %v1305_v60 }
  0x43   :  { %1180 = vmatprep.subr.bf16.mxu1 %v1306_v61 }
  0x45   :  { %1159 = vmatpush3.bf16.msra.mxu0 %v1307_v62 }
  0x46   :  { %1181 = vmatpush3.bf16.msra.mxu1 %v1308_v63  ;;  %1160 = vmatprep.subr.bf16.mxu0 %v1309_v0 }
  0x47   :  { %1182 = vmatprep.subr.bf16.mxu1 %v1310_v1  ;;  %v1087_v1 = vld [vmem:[%s1553_s2] ss:$0 sm:$0xff] }
  0x49   :  { %1161 = vmatpush3.bf16.msra.mxu0 %v1311_v2 }
  0x4a   :  { %1183 = vmatpush3.bf16.msra.mxu1 %v1312_v3  ;;  %1162 = vmatprep.subr.bf16.mxu0 %v1313_v4 }
  0x4b   :  { %1184 = vmatprep.subr.bf16.mxu1 %v1314_v5 }
  0x4d   :  { %1163 = vmatpush3.bf16.msra.mxu0 %v1315_v6 }
  0x4e   :  { %1185 = vmatpush3.bf16.msra.mxu1 %v1316_v7  ;;  %1164 = vmatprep.subr.bf16.mxu0 %v1317_v8 }
  0x4f   :  { %1186 = vmatprep.subr.bf16.mxu1 %v1318_v9 }
  0x51   :  { %1165 = vmatpush3.bf16.msra.mxu0 %v1319_v10 }
  0x52   :  { %1187 = vmatpush3.bf16.msra.mxu1 %v1320_v11  ;;  %1212 = vmatprep.subr.bf16.mxu0 %v1368_v25  ;;  %v1335_v11 = vld [vmem:[%s1556_s5 + $0x30] sm:$0xff]  }
  0x53   :  { %1232 = vmatprep.subr.bf16.mxu1 %v1368_v25 }
  0x54   :  { %705 = vmatmul.mubr.bf16.vlgmr.msra.gmra.mrb[4].mxu0 %v67_v21 }
  0x55   :  { %746 = vmatmul.mubr.bf16.vlgmr.msra.gmra.mrb[4].mxu1 %v69_v23  ;;  %1213 = vmatpush3.bf16.msra.mxu0 %v1321_v24  ;;  %v1097_v23 = vld [vmem:[%s1557_s6] ss:$0 sm:$0xff] }
  0x56   :  { %1214 = vmatprep.subr.bf16.mxu0 %v1368_v25  ;;  %1228 = vmatprep.mubr.msk.bf16.mxu0 %vm1369_vm0, %v1368_v25 }
  0x57   :  { %1248 = vmatprep.mubr.msk.bf16.mxu1 %vm1369_vm0, %v1368_v25  ;;  %1233 = vmatpush3.bf16.msra.mxu1 %v1329_v33 }
  0x58   :  { %1234 = vmatprep.subr.bf16.mxu1 %v1368_v25 }
  0x59   :  { %1215 = vmatpush3.bf16.msra.mxu0 %v1322_v26 }
  0x5a   :  { %1216 = vmatprep.subr.bf16.mxu0 %v1368_v25 }
  0x5b   :  { %1235 = vmatpush3.bf16.msra.mxu1 %v1330_v34 }
  0x5c   :  { %1236 = vmatprep.subr.bf16.mxu1 %v1368_v25 }
  0x5d   :  { %1217 = vmatpush3.bf16.msra.mxu0 %v1323_v27 }
  0x5e   :  { %1218 = vmatprep.subr.bf16.mxu0 %v1368_v25 }
  0x5f   :  { %1237 = vmatpush3.bf16.msra.mxu1 %v1331_v35 }
  0x60   :  { %1238 = vmatprep.subr.bf16.mxu1 %v1368_v25 }
  0x61   :  { %1219 = vmatpush3.bf16.msra.mxu0 %v1324_v28 }
  0x62   :  { %1220 = vmatprep.subr.bf16.mxu0 %v1368_v25 }
  0x63   :  { %1239 = vmatpush3.bf16.msra.mxu1 %v1332_v36 }
  0x64   :  { %1240 = vmatprep.subr.bf16.mxu1 %v1368_v25 }
  0x65   :  { %1221 = vmatpush3.bf16.msra.mxu0 %v1325_v29 }
  0x66   :  { %1222 = vmatprep.subr.bf16.mxu0 %v1368_v25 }
  0x67   :  { %1241 = vmatpush3.bf16.msra.mxu1 %v1333_v37 }
  0x68   :  { %1242 = vmatprep.subr.bf16.mxu1 %v1368_v25 }
  0x69   :  { %1223 = vmatpush3.bf16.msra.mxu0 %v1326_v30 }
  0x6a   :  { %1224 = vmatprep.subr.bf16.mxu0 %v1368_v25 }
  0x6b   :  { %1243 = vmatpush3.bf16.msra.mxu1 %v1334_v38 }
  0x6c   :  { %1244 = vmatprep.subr.bf16.mxu1 %v1368_v25 }
  0x6d   :  { %1225 = vmatpush3.bf16.msra.mxu0 %v1327_v31 }
  0x6e   :  { %1226 = vmatprep.subr.bf16.mxu0 %v1368_v25 }
  0x6f   :  { %1245 = vmatpush3.bf16.msra.mxu1 %v1335_v11 }
  0x70   :  { %1246 = vmatprep.subr.bf16.mxu1 %v1368_v25 }
  0x71   :  { %1227 = vmatpush3.bf16.msra.mxu0 %v1328_v32 }
  0x73   :  { %1247 = vmatpush3.bf16.msra.mxu1 %v1336_v12 }
 0x107   :  { %v1122_v39 = vpop.f32.mrb[0].mxu0 }
 0x108   :  { %v1144_v40 = vpop.f32.mrb[0].mxu1  ;;  %v1123_v41 = vpop.f32.mrb[1].mxu0 }
 0x109   :  { %v1124_v42 = vadd.f32 %v1123_v41, %v1122_v39  ;;  %v1145_v43 = vpop.f32.mrb[1].mxu1  ;;  %v1125_v44 = vpop.f32.mrb[2].mxu0 }
 0x10a   :  { %v1146_v45 = vadd.f32 %v1145_v43, %v1144_v40  ;;  %v1147_v46 = vpop.f32.mrb[2].mxu1  ;;  %v1126_v47 = vpop.f32.mrb[3].mxu0 }
 0x10b   :  { %v1127_v48 = vadd.f32 %v1126_v47, %v1125_v44  ;;  %v1148_v49 = vpop.f32.mrb[3].mxu1 }
 0x10c   :  { %v666_v50 = vadd.f32 %v1146_v45, %v1124_v42  ;;  %v1149_v51 = vadd.f32 %v1148_v49, %v1147_v46 }
 0x10e   :  { %v669_v52 = vadd.f32 %v1149_v51, %v1127_v48 }
 0x127   :  { %v1166_v53 = vpop.f32.mrb[4].mxu0 }
 0x128   :  { %v1188_v54 = vpop.f32.mrb[4].mxu1  ;;  %v1167_v55 = vpop.f32.mrb[5].mxu0 }
 0x129   :  { %v1168_v56 = vadd.f32 %v1167_v55, %v1166_v53  ;;  %v1189_v57 = vpop.f32.mrb[5].mxu1  ;;  %v1169_v58 = vpop.f32.mrb[6].mxu0 }
 0x12a   :  { %v1190_v59 = vadd.f32 %v1189_v57, %v1188_v54  ;;  %v1191_v60 = vpop.f32.mrb[6].mxu1  ;;  %v1170_v61 = vpop.f32.mrb[7].mxu0 }
 0x12b   :  { %v707_v62 = vadd.f32 %v1168_v56, %v666_v50  ;;  %v1171_v63 = vadd.f32 %v1170_v61, %v1169_v58  ;;  %v1192_v0 = vpop.f32.mrb[7].mxu1 }
 0x12c   :  { %v1193_v2 = vadd.f32 %v1192_v0, %v1191_v60 }
 0x12d   :  { %v748_v3 = vadd.f32 %v1190_v59, %v707_v62  ;;  %v710_v4 = vadd.f32 %v1171_v63, %v669_v52 }
 0x12f   :  { %v770_v5 = vadd.f32 %v1087_v1, %v748_v3  ;;  %v751_v6 = vadd.f32 %v1193_v2, %v710_v4 }
 0x131   :  { %v771_v7 = vadd.f32 %v1087_v1, %v751_v6  ;;  %v772_v8 = vmax.f32 %v770_v5, 0.0 }
 0x133   :  { %v773_v9 = vmax.f32 %v771_v7, 0.0 }
 0x135   :  { %v774_v10 = vpack.c.bf16 %v773_v9, %v772_v8 }
 0x137   :  { %1229 = vmatmul.mubr.bf16.vlgmr.msra.gmra.mrb[8].mxu0 %v774_v10 }
 0x20a   :  { %v880_v14 = vpop.f32.mrb[8].mxu0 }
 0x20b   :  { %v881_v15 = vadd.f32 %v1088_v13, %v880_v14  ;;  %v1230_v16 = vpop.f32.mrb[9].mxu0 }
 0x20c   :  { %v883_v17 = vpop.f32.mrb[10].mxu0 }
 0x20d   :  { %v884_v18 = vadd.f32 %v1088_v13, %v883_v17  ;;  %v1231_v19 = vpop.f32.mrb[11].mxu0  ;;  %v887_v20 = vmax.f32 %v881_v15, 0.0 }
 0x20f   :  { %v888_v21 = vmax.f32 %v884_v18, 0.0 }
 0x211   :  { %v889_v22 = vpack.c.bf16 %v888_v21, %v887_v20 }
 0x213   :  { %1249 = vmatmul.mubr.bf16.vlgmr.msra.gmra.mrb[8].mxu1 %v889_v22 }
 0x2e6   :  { %v995_v24 = vpop.f32.mrb[8].mxu1 }
 0x2e7   :  { %v996_v25 = vadd.f32 %v1097_v23, %v995_v24  ;;  %v1250_v26 = vpop.f32.mrb[9].mxu1 }
 0x2e8   :  { %v998_v27 = vpop.f32.mrb[10].mxu1 }
 0x2e9   :  { %v999_v28 = vadd.f32 %v1097_v23, %v998_v27  ;;  %v1251_v29 = vpop.f32.mrb[11].mxu1  ;;  %v1002_v30 = vmul.f32 %v996_v25, %v996_v25 }
 0x2eb   :  { %1004 = vadd.xlane.f32.xlu0 %v1002_v30  ;;  %v1003_v31 = vmul.f32 %v999_v28, %v999_v28 }
 0x2ef   :  { %1006 = vadd.xlane.f32.xlu0 %v1003_v31 }
 0x378   :  { %v1005_v32 = vpop.xlane.xlu0 %1004 }
 0x379   :  { %v1008_v33 = vmax.f32 %v1005_v32, 1e-24 }
 0x37b   :  { %1337 = vrsqrt.f32 %v1008_v33 }
 0x37c   :  { %v1007_v34 = vpop.xlane.xlu0 %1006 }
 0x37d   :  { %v1009_v35 = vmax.f32 %v1007_v34, 1e-24 }
 0x37f   :  { %1339 = vrsqrt.f32 %v1009_v35 }
 0x385   :  { %v1338_v36 = vpop.eup %1337 }
 0x386   :  { %v1012_v37 = vmul.f32 %v1338_v36, %v996_v25 }
 0x388   :  { %1014 = vst [vmem:[%s1558_s7] sm:$0xff] %v1012_v37 }
 0x389   :  { %v1340_v38 = vpop.eup %1339 }
 0x38a   :  { %v1013_v39 = vmul.f32 %v1340_v38, %v999_v28 }
 0x38c   :  { %1015 = vst [vmem:[%s1558_s7 + $0x8] sm:$0xff] %v1013_v39 }
 0x38d   :  { %1020 = vsyncpa [#allocation4], 1 }

</bundles_post_ra>
